<compile_context>
chip_gen: v6e
topology: v6e:2x2x1
jax: 0.10.0
libtpu: 0.0.40
codegen_flags: <defaults>
</compile_context>

<pallas_src>
import jax
import jax.numpy as jnp
from jax.experimental import pallas as pl
from jax.experimental.pallas import tpu as pltpu


def _round_up(n, m):
    return ((n + m - 1) // m) * m


def _floor_mult(n, m):
    return max(m, (n // m) * m)


def _is_v7x():
    try:
        return "v7" in jax.devices()[0].device_kind.lower()
    except Exception:
        return False


# ---------------------------------------------------------------------------
# Kernel bodies
# ---------------------------------------------------------------------------
def _ff_step(x_ref, w1_ref, b1_ref, w2_ref, b2_ref, o_ref, acc_ref, final_cast):
    # x_ref:  (tm, Hp)  bf16 row tile (same tile for all j)
    # w1_ref: (Hp, tf)  bf16 first-layer weight slice
    # b1_ref: (1, tf)   f32 first-layer bias slice
    # w2_ref: (tf, Hp)  bf16 second-layer weight slice
    # b2_ref: (1, Hp)   f32 full second-layer bias (resident)
    # o_ref:  (tm, Hp)  output tile
    # acc_ref:(tm, Hp)  f32 accumulator (== o_ref when output dtype is f32)
    j = pl.program_id(1)

    @pl.when(j == 0)
    def _():
        # Fold b2 into the accumulator init: added exactly once per output tile.
        acc_ref[...] = jnp.broadcast_to(
            b2_ref[...].astype(jnp.float32), acc_ref.shape)

    # h_tile = relu(x @ w1_tile + b1_tile), f32 accumulation on the MXU.
    h = jnp.dot(x_ref[...], w1_ref[...], preferred_element_type=jnp.float32)
    h = jnp.maximum(h + b1_ref[...], 0.0)
    # (Dropout: identity in eval mode.)
    acc_ref[...] += jnp.dot(h.astype(w2_ref.dtype), w2_ref[...],
                            preferred_element_type=jnp.float32)

    if final_cast:
        @pl.when(j == pl.num_programs(1) - 1)
        def _():
            o_ref[...] = acc_ref[...].astype(o_ref.dtype)


def _ff_kernel_acc(x_ref, w1_ref, b1_ref, w2_ref, b2_ref, o_ref, acc_ref):
    # Output narrower than f32: accumulate in scratch, cast on last j.
    _ff_step(x_ref, w1_ref, b1_ref, w2_ref, b2_ref, o_ref, acc_ref,
             final_cast=True)


def _ff_kernel_fused(x_ref, w1_ref, b1_ref, w2_ref, b2_ref, o_ref):
    # f32 output: the resident output block is the accumulator (no scratch).
    _ff_step(x_ref, w1_ref, b1_ref, w2_ref, b2_ref, o_ref, o_ref,
             final_cast=False)


# ---------------------------------------------------------------------------
# Tiling / VMEM budgeting
# ---------------------------------------------------------------------------
def _pick_tf(Fp, tf_req):
    """Largest multiple of 128 <= tf_req that divides Fp."""
    tf = min(_round_up(max(tf_req, 128), 128), Fp)
    while Fp % tf != 0:
        tf -= 128
    return tf


def _choose_tiles(M, Hp, Fp, out_bytes, acc_in_out, tm_req, tf_req):
    is_v7 = _is_v7x()
    budget = (48 << 20) if is_v7 else (96 << 20)   # per-TC VMEM headroom

    tm = min(_round_up(tm_req, 8), _round_up(M, 8))
    tf = _pick_tf(Fp, tf_req)

    def working_set(tm_, tf_):
        # Double-buffered pipeline working set (bf16 inputs/weights).
        xin = 2 * tm_ * Hp * 2
        w1 = 2 * Hp * tf_ * 2
        b1 = 2 * tf_ * 4
        w2 = 2 * tf_ * Hp * 2
        b2 = 2 * Hp * 4
        out = 2 * tm_ * Hp * out_bytes
        acc = 0 if acc_in_out else tm_ * Hp * 4
        return xin + w1 + b1 + w2 + b2 + out + acc

    # Shrink the ffn tile first (keeps row reuse high), then the row tile.
    while working_set(tm, tf) > budget and tf > 128:
        tf = _pick_tf(Fp, tf // 2)
    while working_set(tm, tf) > budget and tm > 128:
        tm = _floor_mult(tm // 2, 8)

    # v7x megacore: ensure >= 2 row tiles so both TensorCores get work.
    if is_v7 and M > 8:
        while (_round_up(M, tm) // tm) < 2 and tm > 8:
            tm = _floor_mult(tm // 2, 8)

    ws = working_set(tm, tf)
    cap = (60 << 20) if is_v7 else (120 << 20)
    vmem_limit = int(min(cap, max(ws + ws // 2, 16 << 20)))
    return tm, tf, vmem_limit


# ---------------------------------------------------------------------------
# Parameter prep (call once, NOT per forward)
# ---------------------------------------------------------------------------
def prepare_ff_params(w1, b1, w2, b2, *, compute_dtype=jnp.bfloat16):
    """Cast to compute_dtype and pad to lane-dense multiples of 128, once."""
    H, F = w1.shape
    Hp = _round_up(H, 128)
    Fp = _round_up(F, 128)
    w1p = jnp.pad(w1.astype(compute_dtype), ((0, Hp - H), (0, Fp - F)))
    b1p = jnp.pad(b1.reshape(1, F).astype(jnp.float32), ((0, 0), (0, Fp - F)))
    w2p = jnp.pad(w2.astype(compute_dtype), ((0, Fp - F), (0, Hp - H)))
    b2p = jnp.pad(b2.reshape(1, H).astype(jnp.float32), ((0, 0), (0, Hp - H)))
    return {"w1": w1p, "b1": b1p, "w2": w2p, "b2": b2p,
            "H": H, "F": F, "compute_dtype": compute_dtype}


# ---------------------------------------------------------------------------
# Forward
# ---------------------------------------------------------------------------
def feed_forward(x, params, *, tm=512, tf=256, out_dtype=None):
    """x: (..., H).  params: from prepare_ff_params().  Returns (..., H)."""
    lead = x.shape[:-1]
    H = params["H"]
    compute_dtype = params["compute_dtype"]
    w1p, b1p, w2p, b2p = params["w1"], params["b1"], params["w2"], params["b2"]
    Hp, Fp = w1p.shape

    M = 1
    for d in lead:
        M *= d

    out_dtype = out_dtype if out_dtype is not None else x.dtype
    out_bytes = jnp.dtype(out_dtype).itemsize
    acc_in_out = (jnp.dtype(out_dtype) == jnp.float32)

    tm, tf, vmem_limit = _choose_tiles(M, Hp, Fp, out_bytes, acc_in_out, tm, tf)
    Mp = _round_up(M, tm)

    # Activations are cast/padded per call (they change every call; weights don't).
    x2 = jnp.pad(x.reshape(M, H).astype(compute_dtype),
                 ((0, Mp - M), (0, Hp - H)))

    in_specs = [
        pl.BlockSpec((tm, Hp), lambda i, j: (i, 0)),   # x rows (reused over j)
        pl.BlockSpec((Hp, tf), lambda i, j: (0, j)),   # w1 F-slice
        pl.BlockSpec((1, tf), lambda i, j: (0, j)),    # b1 F-slice
        pl.BlockSpec((tf, Hp), lambda i, j: (j, 0)),   # w2 F-slice
        pl.BlockSpec((1, Hp), lambda i, j: (0, 0)),    # b2 (resident)
    ]
    out_spec = pl.BlockSpec((tm, Hp), lambda i, j: (i, 0))

    if acc_in_out:
        kernel = _ff_kernel_fused
        scratch = []
    else:
        kernel = _ff_kernel_acc
        scratch = [pltpu.VMEM((tm, Hp), jnp.float32)]

    out2 = pl.pallas_call(
        kernel,
        out_shape=jax.ShapeDtypeStruct((Mp, Hp), out_dtype),
        grid_spec=pltpu.PrefetchScalarGridSpec(
            num_scalar_prefetch=0,
            grid=(Mp // tm, Fp // tf),                 # rows, then F (reduction last)
            in_specs=in_specs,
            out_specs=out_spec,
            scratch_shapes=scratch,
        ),
        compiler_params=pltpu.CompilerParams(
            dimension_semantics=("parallel", "arbitrary"),
            vmem_limit_bytes=vmem_limit),
    )(x2, w1p, b1p, w2p, b2p)

    return out2[:M, :H].reshape(*lead, H)


def init_params(key, hidden_size, ff_size, dtype=jnp.float32):
    """Deterministic init mimicking nn.Linear defaults (U(-1/sqrt(fan_in), 1/sqrt(fan_in)))."""
    k1, k2, k3, k4 = jax.random.split(key, 4)
    bound1 = 1.0 / (hidden_size ** 0.5)
    bound2 = 1.0 / (ff_size ** 0.5)
    # Stored already transposed as (in_features, out_features) for row-major matmul.
    w1 = jax.random.uniform(k1, (hidden_size, ff_size), dtype, -bound1, bound1)
    b1 = jax.random.uniform(k2, (ff_size,), dtype, -bound1, bound1)
    w2 = jax.random.uniform(k3, (ff_size, hidden_size), dtype, -bound2, bound2)
    b2 = jax.random.uniform(k4, (hidden_size,), dtype, -bound2, bound2)
    return w1, b1, w2, b2


if __name__ == "__main__":
    batch, seq, hidden = 2, 8, 32
    ff = hidden * 4  # default ff_size = hidden_size * 4

    key = jax.random.PRNGKey(0)
    kx, kp = jax.random.split(key)
    x = jax.random.normal(kx, (batch, seq, hidden), dtype=jnp.float32)
    w1, b1, w2, b2 = init_params(kp, hidden, ff)

    # Weights are cast/padded exactly once.
    ff_params = prepare_ff_params(w1, b1, w2, b2)

    out = feed_forward(x, ff_params)
    out = jax.block_until_ready(out)
    assert out.shape == (batch, seq, hidden)
    assert out.dtype == x.dtype

    # Reference in plain JAX with the same bf16-input / f32-accumulate recipe.
    xr = x.reshape(-1, hidden).astype(jnp.bfloat16)
    h_ref = jnp.maximum(
        jnp.dot(xr, w1.astype(jnp.bfloat16), preferred_element_type=jnp.float32)
        + b1.reshape(1, -1), 0.0)
    ref = (jnp.dot(h_ref.astype(jnp.bfloat16), w2.astype(jnp.bfloat16),
                   preferred_element_type=jnp.float32)
           + b2.reshape(1, -1)).reshape(batch, seq, hidden).astype(x.dtype)

    assert jnp.allclose(out, ref, atol=2e-2, rtol=2e-2), "mismatch vs reference"

    # Also exercise the bf16-output (scratch-accumulator) path once.
    out_bf16 = jax.block_until_ready(
        feed_forward(x, ff_params, out_dtype=jnp.bfloat16))
    assert out_bf16.shape == (batch, seq, hidden)
    assert jnp.allclose(out_bf16.astype(jnp.float32), ref, atol=5e-2, rtol=5e-2)

    print("KERNEL_OK")
</pallas_src>

<mosaic_0001>
module attributes {stable_mosaic.version = 11 : i64} {
  func.func @_ff_kernel_fused(%arg0: i32, %arg1: i32, %arg2: memref<16x128xbf16, #tpu.memory_space<vmem>>, %arg3: memref<128x128xbf16, #tpu.memory_space<vmem>>, %arg4: memref<1x128xf32, #tpu.memory_space<vmem>>, %arg5: memref<128x128xbf16, #tpu.memory_space<vmem>>, %arg6: memref<1x128xf32, #tpu.memory_space<vmem>>, %arg7: memref<16x128xf32, #tpu.memory_space<vmem>>) attributes {dimension_semantics = [#tpu.dimension_semantics<parallel>, #tpu.dimension_semantics<arbitrary>], iteration_bounds = array<i64: 1, 1>, scalar_prefetch = 0 : i64, scratch_operands = 0 : i64, tpu.core_type = #tpu.core_type<tc>, window_params = [{transform_indices = @transform_0, window_bounds = array<i64: 16, 128>}, {transform_indices = @transform_1, window_bounds = array<i64: 128, 128>}, {transform_indices = @transform_2, window_bounds = array<i64: 1, 128>}, {transform_indices = @transform_3, window_bounds = array<i64: 128, 128>}, {pipeline_mode = #tpu.pipeline_mode<synchronous>, transform_indices = @transform_4, window_bounds = array<i64: 1, 128>}, {transform_indices = @transform_5, window_bounds = array<i64: 16, 128>}]} {
    %c0_i32 = arith.constant 0 : i32
    %0 = arith.cmpi eq, %arg1, %c0_i32 : i32
    %1 = arith.extui %0 : i1 to i32
    %c0_i32_0 = arith.constant 0 : i32
    %2 = arith.cmpi ne, %1, %c0_i32_0 : i32
    scf.if %2 {
      %c0_14 = arith.constant 0 : index
      %c0_15 = arith.constant 0 : index
      %17 = vector.load %arg6[%c0_14, %c0_15] : memref<1x128xf32, #tpu.memory_space<vmem>>, vector<1x128xf32>
      %18 = vector.shape_cast %17 : vector<1x128xf32> to vector<1x128xf32>
      %19 = vector.broadcast %18 : vector<1x128xf32> to vector<16x128xf32>
      %c0_16 = arith.constant 0 : index
      %c0_17 = arith.constant 0 : index
      %20 = vector.load %arg7[%c0_16, %c0_17] : memref<16x128xf32, #tpu.memory_space<vmem>>, vector<16x128xf32>
      tpu.vector_store %arg7[%c0_16, %c0_17], %19 {strides = array<i32>} : memref<16x128xf32, #tpu.memory_space<vmem>>, vector<16x128xf32>,
    } else {
    }
    %c0 = arith.constant 0 : index
    %c0_1 = arith.constant 0 : index
    %3 = vector.load %arg2[%c0, %c0_1] : memref<16x128xbf16, #tpu.memory_space<vmem>>, vector<16x128xbf16>
    %c0_2 = arith.constant 0 : index
    %c0_3 = arith.constant 0 : index
    %4 = vector.load %arg3[%c0_2, %c0_3] : memref<128x128xbf16, #tpu.memory_space<vmem>>, vector<128x128xbf16>
    %cst = arith.constant dense<0.000000e+00> : vector<16x128xf32>
    %5 = tpu.matmul %3, %4, %cst {dimension_numbers = #tpu.dot_dimension_numbers<[1], [0], [0], [1], [0, 0, 1, 1], [], []>} : vector<16x128xbf16>, vector<128x128xbf16>, vector<16x128xf32> -> vector<16x128xf32>
    %c0_4 = arith.constant 0 : index
    %c0_5 = arith.constant 0 : index
    %6 = vector.load %arg4[%c0_4, %c0_5] : memref<1x128xf32, #tpu.memory_space<vmem>>, vector<1x128xf32>
    %7 = vector.broadcast %6 : vector<1x128xf32> to vector<16x128xf32>
    %8 = arith.addf %5, %7 : vector<16x128xf32>
    %cst_6 = arith.constant 0.000000e+00 : f32
    %9 = vector.broadcast %cst_6 : f32 to vector<16x128xf32>
    %10 = arith.maximumf %8, %9 : vector<16x128xf32>
    %c0_7 = arith.constant 0 : index
    %c0_8 = arith.constant 0 : index
    %11 = vector.load %arg7[%c0_7, %c0_8] : memref<16x128xf32, #tpu.memory_space<vmem>>, vector<16x128xf32>
    %12 = arith.truncf %10 : vector<16x128xf32> to vector<16x128xbf16>
    %c0_9 = arith.constant 0 : index
    %c0_10 = arith.constant 0 : index
    %13 = vector.load %arg5[%c0_9, %c0_10] : memref<128x128xbf16, #tpu.memory_space<vmem>>, vector<128x128xbf16>
    %cst_11 = arith.constant dense<0.000000e+00> : vector<16x128xf32>
    %14 = tpu.matmul %12, %13, %cst_11 {dimension_numbers = #tpu.dot_dimension_numbers<[1], [0], [0], [1], [0, 0, 1, 1], [], []>} : vector<16x128xbf16>, vector<128x128xbf16>, vector<16x128xf32> -> vector<16x128xf32>
    %15 = arith.addf %11, %14 : vector<16x128xf32>
    %c0_12 = arith.constant 0 : index
    %c0_13 = arith.constant 0 : index
    %16 = vector.load %arg7[%c0_12, %c0_13] : memref<16x128xf32, #tpu.memory_space<vmem>>, vector<16x128xf32>
    tpu.vector_store %arg7[%c0_12, %c0_13], %15 {strides = array<i32>} : memref<16x128xf32, #tpu.memory_space<vmem>>, vector<16x128xf32>,
    return
  }
  func.func @transform_0(%arg0: i32, %arg1: i32) -> (i32, i32) {
    %c0_i32 = arith.constant 0 : i32
    %c0_i32_0 = arith.constant 0 : i32
    return %arg0, %c0_i32 : i32, i32
  }
  func.func @transform_1(%arg0: i32, %arg1: i32) -> (i32, i32) {
    %c0_i32 = arith.constant 0 : i32
    %c0_i32_0 = arith.constant 0 : i32
    return %c0_i32, %arg1 : i32, i32
  }
  func.func @transform_2(%arg0: i32, %arg1: i32) -> (i32, i32) {
    %c0_i32 = arith.constant 0 : i32
    %c0_i32_0 = arith.constant 0 : i32
    return %c0_i32, %arg1 : i32, i32
  }
  func.func @transform_3(%arg0: i32, %arg1: i32) -> (i32, i32) {
    %c0_i32 = arith.constant 0 : i32
    %c0_i32_0 = arith.constant 0 : i32
    return %arg1, %c0_i32 : i32, i32
  }
  func.func @transform_4(%arg0: i32, %arg1: i32) -> (i32, i32) {
    %c0_i32 = arith.constant 0 : i32
    %c0_i32_0 = arith.constant 0 : i32
    %c0_i32_1 = arith.constant 0 : i32
    return %c0_i32, %c0_i32_0 : i32, i32
  }
  func.func @transform_5(%arg0: i32, %arg1: i32) -> (i32, i32) {
    %c0_i32 = arith.constant 0 : i32
    %c0_i32_0 = arith.constant 0 : i32
    return %arg0, %c0_i32 : i32, i32
  }
}

</mosaic_0001>

<bundles_post_ra>
// kernel: tpu_custom_call.1
= control target key start
LH: loop header
LB: loop body
LE: loop exit
PB: predicated region body
PF: predicated region fallthrough
CT: control target
= control target key end

     0   :  { %10 = vsyncpa [#allocation3], 0  ;;  %s576_s0 = inlined_call_operand.hbm [shape: bf16[16,128], index: 0, kind: input, shape index: {}]   ;;  %s577_s1 = inlined_call_operand.hbm [shape: bf16[128,128], index: 1, kind: input, shape index: {}]   ;;  %s578_s2 = inlined_call_operand.vmem [shape: f32[1,128], index: 2, kind: input, shape index: {}]   ;;  %s579_s3 = inlined_call_operand.hbm [shape: bf16[128,128], index: 3, kind: input, shape index: {}]   ;;  %s580_s4 = inlined_call_operand.vmem [shape: f32[1,128], index: 4, kind: input, shape index: {}]   ;;  %s581_s5 = inlined_call_operand.hbm [shape: f32[16,128], index: 5, kind: output, shape index: {}]  }
   0x1   :  { %11 = vsyncpa [#allocation6], 0 }
   0x2   :  { %12 = vsyncpa [#allocation4], 0  ;;  %s518_s18 = smov [#allocation5]   ;;  %s519_s20 = smov [#allocation2]  }
   0x3   :  { %s30_s19 = sshll.u32 %s518_s18, 4  ;;  %s18_s21 = sshll.u32 %s519_s20, 4  ;;  %s31_s19 = int_to_ptr.vmem [resolvable:$true] %s30_s19  ;;  %s19_s21 = int_to_ptr.vmem [resolvable:$true] %s18_s21 }
   0x4   :  { %s440_s22 = scalar_lea.vmem %s31_s19, 1024  ;;  %p445_p1 = scmp.lt.s32.totalorder %s31_s19, %s31_s19 }
   0x5   :  { %p441_p0 = scmp.ne.s32.totalorder %s31_s19, %s440_s22  ;;  %p446_p2 = scmp.lt.s32.totalorder %s440_s22, %s440_s22 }
   0x7   :  { %p447_p3 = por %p446_p2, %p445_p1 }
   0x9   :  { %p448_p4 = pnand %p447_p3, %p441_p0 }
   0xb   :  { %451 = shalt.err (!%p448_p4)
}
   0xc   :  { %s520_s23 = smov 64   ;;  %s521_s24 = smov 4  }
   0xd   :  { %36 = dma.hbm_to_vmem [thread:$0]  %s577_s1, 1024, %s31_s19, [#allocation6], %s520_s23, %s520_s23, %s521_s24  }
   0xe   :  { %s460_s27 = scalar_lea.vmem %s19_s21, 128  ;;  %p465_p6 = scmp.lt.s32.totalorder %s19_s21, %s19_s21 }
   0xf   :  { %p461_p5 = scmp.ne.s32.totalorder %s19_s21, %s460_s27  ;;  %p466_p7 = scmp.lt.s32.totalorder %s460_s27, %s460_s27 }
  0x11   :  { %p467_p8 = por %p466_p7, %p465_p6 }
  0x13   :  { %p468_p9 = pnand %p467_p8, %p461_p5 }
  0x15   :  { %471 = shalt.err (!%p468_p9)
}
  0x16   :  { %24 = dma.hbm_to_vmem [thread:$0]  %s576_s0, 128, %s19_s21, [#allocation3], %s520_s23, %s520_s23, %s521_s24  }
  0x17   :  { %s522_s30 = smov [#allocation7]  }
  0x18   :  { %s44_s6 = sshll.u32 %s522_s30, 4  ;;  %s45_s6 = int_to_ptr.vmem [resolvable:$true] %s44_s6 }
  0x19   :  { %s480_s7 = scalar_lea.vmem %s45_s6, 1024  ;;  %p485_p11 = scmp.lt.s32.totalorder %s45_s6, %s45_s6 }
  0x1a   :  { %p481_p10 = scmp.ne.s32.totalorder %s45_s6, %s480_s7  ;;  %p486_p12 = scmp.lt.s32.totalorder %s480_s7, %s480_s7 }
  0x1c   :  { %p487_p13 = por %p486_p12, %p485_p11 }
  0x1e   :  { %p488_p0 = pnand %p487_p13, %p481_p10 }
  0x20   :  { %491 = shalt.err (!%p488_p0)
}
  0x21   :  { %50 = dma.hbm_to_vmem [thread:$0]  %s579_s3, 1024, %s45_s6, [#allocation6], %s520_s23, %s520_s23, %s521_s24  }
  0x22   :  { %512 = dma.done.wait [#allocation3], 128  }
  0x23   :  { %513 = vsyncadd [#allocation3], 4294967168 }
  0x24   :  { %514 = dma.done.wait [#allocation6], 2048  }
  0x25   :  { %515 = vsyncadd [#allocation6], 4294965248  ;;  %v523_v0 = vmov 0.0   ;;  %vm524_vm0 = vmmov 0   ;;  %v415_v1 = vld [vmem:[#allocation5 + $0x38] sm:$0xff]   ;;  %v416_v2 = vld [vmem:[#allocation5 + $0x30] sm:$0xff]  }
  0x26   :  { %365 = vmatprep.subr.bf16.mxu0 %v523_v0  ;;  %381 = vmatprep.mubr.msk.bf16.mxu0 %vm524_vm0, %v523_v0  ;;  %v417_v3 = vld [vmem:[#allocation5 + $0x28] sm:$0xff]   ;;  %v424_v4 = vld [vmem:[#allocation7 + $0x38] sm:$0xff]   ;;  %v418_v5 = vld [vmem:[#allocation5 + $0x20] sm:$0xff]   ;;  %s525_s11 = smov [#allocation8]  }
  0x27   :  { %385 = vmatprep.subr.bf16.mxu1 %v523_v0  ;;  %401 = vmatprep.mubr.msk.bf16.mxu1 %vm524_vm0, %v523_v0  ;;  %v425_v6 = vld [vmem:[#allocation7 + $0x30] sm:$0xff]   ;;  %v419_v7 = vld [vmem:[#allocation5 + $0x18] sm:$0xff]   ;;  %v426_v8 = vld [vmem:[#allocation7 + $0x28] sm:$0xff]   ;;  %s315_s12 = sshll.u32 %s525_s11, 4  ;;  %s316_s12 = int_to_ptr.vmem [resolvable:$true] %s315_s12 }
  0x28   :  { %366 = vmatpush3.bf16.msra.mxu0 %v415_v1  ;;  %386 = vmatpush3.bf16.msra.mxu1 %v424_v4  ;;  %v420_v9 = vld [vmem:[#allocation5 + $0x10] sm:$0xff]   ;;  %v427_v10 = vld [vmem:[#allocation7 + $0x20] sm:$0xff]   ;;  %v421_v11 = vld [vmem:[#allocation5 + $0x8] sm:$0xff]   ;;  %p497_p2 = scmp.lt.s32.totalorder %s316_s12, %s316_s12 }
  0x29   :  { %367 = vmatprep.subr.bf16.mxu0 %v523_v0  ;;  %387 = vmatprep.subr.bf16.mxu1 %v523_v0  ;;  %v428_v12 = vld [vmem:[#allocation7 + $0x18] sm:$0xff]   ;;  %v422_v13 = vld [vmem:[#allocation5] sm:$0xff]   ;;  %v429_v15 = vld [vmem:[#allocation7 + $0x10] sm:$0xff]  }
  0x2a   :  { %v423_v14 = vld [vmem:[#allocation2] sm:$0xff]   ;;  %v430_v16 = vld [vmem:[#allocation7 + $0x8] sm:$0xff]   ;;  %v431_v17 = vld [vmem:[#allocation7] sm:$0xff]  }
  0x2b   :  { %v329_v18 = vld [vmem:[%s578_s2] ss:$0 sm:$0xff]  ;;  %s492_s2 = scalar_lea.vmem %s316_s12, 256 }
  0x2c   :  { %368 = vmatpush3.bf16.msra.mxu0 %v416_v2  ;;  %388 = vmatpush3.bf16.msra.mxu1 %v425_v6  ;;  %v328_v28 = vld [vmem:[%s580_s4] ss:$0 sm:$0xff]  ;;  %p493_p1 = scmp.ne.s32.totalorder %s316_s12, %s492_s2  ;;  %p498_p3 = scmp.lt.s32.totalorder %s492_s2, %s492_s2 }
  0x2d   :  { %369 = vmatprep.subr.bf16.mxu0 %v523_v0  ;;  %389 = vmatprep.subr.bf16.mxu1 %v523_v0 }
  0x2e   :  { %p499_p4 = por %p498_p3, %p497_p2 }
  0x30   :  { %370 = vmatpush3.bf16.msra.mxu0 %v417_v3  ;;  %390 = vmatpush3.bf16.msra.mxu1 %v426_v8  ;;  %p500_p5 = pnand %p499_p4, %p493_p1 }
  0x31   :  { %371 = vmatprep.subr.bf16.mxu0 %v523_v0  ;;  %391 = vmatprep.subr.bf16.mxu1 %v523_v0 }
  0x34   :  { %372 = vmatpush3.bf16.msra.mxu0 %v418_v5  ;;  %392 = vmatpush3.bf16.msra.mxu1 %v427_v10 }
  0x35   :  { %373 = vmatprep.subr.bf16.mxu0 %v523_v0  ;;  %393 = vmatprep.subr.bf16.mxu1 %v523_v0 }
  0x38   :  { %374 = vmatpush3.bf16.msra.mxu0 %v419_v7  ;;  %394 = vmatpush3.bf16.msra.mxu1 %v428_v12 }
  0x39   :  { %375 = vmatprep.subr.bf16.mxu0 %v523_v0  ;;  %395 = vmatprep.subr.bf16.mxu1 %v523_v0 }
  0x3c   :  { %376 = vmatpush3.bf16.msra.mxu0 %v420_v9  ;;  %396 = vmatpush3.bf16.msra.mxu1 %v429_v15 }
  0x3d   :  { %377 = vmatprep.subr.bf16.mxu0 %v523_v0  ;;  %397 = vmatprep.subr.bf16.mxu1 %v523_v0 }
  0x40   :  { %378 = vmatpush3.bf16.msra.mxu0 %v421_v11  ;;  %398 = vmatpush3.bf16.msra.mxu1 %v430_v16 }
  0x41   :  { %379 = vmatprep.subr.bf16.mxu0 %v523_v0  ;;  %399 = vmatprep.subr.bf16.mxu1 %v523_v0 }
  0x44   :  { %380 = vmatpush3.bf16.msra.mxu0 %v422_v13  ;;  %400 = vmatpush3.bf16.msra.mxu1 %v431_v17 }
  0x47   :  { %382 = vmatmul.mubr.bf16.vlgmr.msra.gmra.mxu0 %v423_v14 }
 0x107   :  { %v189_v19 = vpop.f32.mrf.mxu0 }
 0x108   :  { %v190_v21 = vadd.f32 %v329_v18, %v189_v19 }
 0x109   :  { %v383_v20 = vpop.f32.mrf.mxu0 }
 0x10a   :  { %v196_v25 = vmax.f32 %v190_v21, 0.0 }
 0x10b   :  { %v192_v22 = vpop.f32.mrf.mxu0 }
 0x10c   :  { %v193_v23 = vadd.f32 %v329_v18, %v192_v22 }
 0x10d   :  { %v384_v24 = vpop.f32.mrf.mxu0 }
 0x10e   :  { %v197_v26 = vmax.f32 %v193_v23, 0.0 }
 0x110   :  { %v200_v27 = vpack.c.bf16 %v197_v26, %v196_v25 }
 0x112   :  { %402 = vmatmul.mubr.bf16.vlgmr.msra.gmra.mxu1 %v200_v27 }
 0x1d2   :  { %v299_v29 = vpop.f32.mrf.mxu1 }
 0x1d3   :  { %v306_v30 = vadd.f32 %v328_v28, %v299_v29 }
 0x1d4   :  { %v403_v31 = vpop.f32.mrf.mxu1 }
 0x1d5   :  { %308 = vst [vmem:[#allocation8] sm:$0xff] %v306_v30 }
 0x1d6   :  { %v302_v32 = vpop.f32.mrf.mxu1 }
 0x1d7   :  { %v307_v33 = vadd.f32 %v328_v28, %v302_v32 }
 0x1d8   :  { %v404_v34 = vpop.f32.mrf.mxu1 }
 0x1d9   :  { %309 = vst [vmem:[#allocation8 + $0x8] sm:$0xff] %v307_v33 }
 0x1da   :  { %503 = shalt.err (!%p500_p5)
}
 0x1db   :  { %s526_s13 = smov 128   ;;  %s527_s4 = smov 8  }
 0x1dc   :  { %321 = dma.vmem_to_hbm [thread:$0]  %s316_s12, 256, %s581_s5, [#allocation4], %s526_s13, %s526_s13, %s527_s4  }
 0x1dd   :  { %516 = dma.done.wait [#allocation4], 256  }
 0x1de   :  { %517 = vsyncadd [#allocation4], 4294967040 }
 0x1df   :  { %325 = vsyncpa [#allocation3], 1 }
 0x1e0   :  { %326 = vsyncpa [#allocation6], 1 }
 0x1e1   :  { %327 = vsyncpa [#allocation4], 1 }

</bundles_post_ra>
